<compile_context>
chip_gen: v7x
topology: tpu7x:2x2x1
jax: 0.10.0
libtpu: 0.0.40
codegen_flags: <defaults>
</compile_context>

<pallas_src>
import math
from functools import partial

import jax
import jax.numpy as jnp
from jax import lax
from jax.experimental import pallas as pl
from jax.experimental.pallas import tpu as pltpu


def _round_up(a, b):
    return (a + b - 1) // b * b


# ----------------------------------------------------------------------------
# Kernel 1: packed im2col matmul -> merged lane-dense (yt | s) slab
# ----------------------------------------------------------------------------
def _conv_kernel(x_ref, w_ref, b_ref, m_ref, o_ref, *, K, Wp, HWw, Ct, Cr):
    x = x_ref[0]                                   # (Cin_p, Lp), flat padded img

    # im2col: contiguous lane windows, one per kernel tap (no reshapes needed).
    wins = [x[:, ki * Wp + kj: ki * Wp + kj + HWw]
            for ki in range(K) for kj in range(K)]            # each (Cin_p, HWw)
    rhs = jnp.concatenate(wins + [w * w for w in wins], axis=0)  # (2*K*K*Cin_p, HWw)

    # Single packed MXU matmul for convt / convr / convT(x^2, Wr^2).
    acc = jnp.dot(w_ref[...], rhs, preferred_element_type=jnp.float32)
    acc = acc + b_ref[...]                         # (Ct+2*Cr, HWw) + (Ct+2*Cr, 1)

    yt = acc[:Ct]                                  # convt(x) + bt
    yr = acc[Ct:Ct + Cr]                           # convr(x) + br
    v = acc[Ct + Cr:]                              # convT(x^2, Wr^2) + br^2
    s = yr * yr - v                                # + secondary_bias (== 0 default)

    m = m_ref[...]                                 # (1, HWw) valid-column mask
    o_ref[0, :Ct, :] = yt * m                      # merged output: yt in [0:Ct]
    o_ref[0, Ct:, :] = s * m                       #                 s in [Ct:]


# ----------------------------------------------------------------------------
# Kernel 2: BatchNorm (training stats), BatchBound, leaky_relu — per channel tile
# ----------------------------------------------------------------------------
def _norm_bound_kernel(x_ref, o_ref, *, eps, count, n_relu_tiles):
    x = x_ref[...]                                 # (N, Ctile, HWw)
    inv_cnt = 1.0 / count                          # true count (masked cols are 0)

    # One-pass per-channel stats over (N, HW): sum and sum-of-squares.
    ssum = jnp.sum(x, axis=(0, 2), keepdims=True)          # (1, Ctile, 1)
    ssq = jnp.sum(x * x, axis=(0, 2), keepdims=True)
    mean = ssum * inv_cnt
    var = ssq * inv_cnt - mean * mean
    inv_std = lax.rsqrt(var + eps)                          # EUP rsqrt
    n = (x - mean) * inv_std

    tile = pl.program_id(0)

    @pl.when(tile < n_relu_tiles)                  # relu_channels: BN + leaky_relu
    def _():
        o_ref[...] = jnp.where(n >= 0, n, 0.02 * n)

    @pl.when(tile >= n_relu_tiles)                 # resqu_channels: BN + bound + lrelu
    def _():
        maxi = jnp.max(jnp.abs(n), axis=0, keepdims=True)   # amax over batch
        b = n * pl.reciprocal(maxi)
        o_ref[...] = jnp.where(b >= 0, b, 0.02 * b)


# ----------------------------------------------------------------------------
# Wrapper
# ----------------------------------------------------------------------------
def split_resqu_conv_transpose(x_nchw, Wt, bt, Wr, br, *, K, eps=1e-5):
    """x_nchw: (N, Cin, H, W); Wt/Wr in PyTorch ConvTranspose2d layout (Cin, Cout, K, K)."""
    N, Cin, H, W = x_nchw.shape
    Ct = Wt.shape[1]
    Cr = Wr.shape[1]
    # TODO(synk): relax the multiple-of-8 channel-tile granularity.
    assert Ct % 8 == 0 and Cr % 8 == 0

    Ho, Wo = H + K - 1, W + K - 1
    Hp, Wp = H + 2 * (K - 1), W + 2 * (K - 1)
    HWw = Ho * Wp                          # "wide" flattened output length (lanes)
    Cin_p = _round_up(Cin, 8)              # sublane-align the input channels
    Lp = _round_up(Hp * Wp + (K - 1), 128)  # flat padded input length (lanes)
    KKC = K * K * Cin_p
    Cp = Ct + 2 * Cr
    Ctot = Ct + Cr

    # (K-1)-zero-pad spatially, zero-pad channels, flatten HW, pad flat tail.
    xp = jnp.pad(x_nchw.astype(jnp.float32),
                 ((0, 0), (0, Cin_p - Cin), (K - 1, K - 1), (K - 1, K - 1)))
    xflat = jnp.pad(xp.reshape(N, Cin_p, Hp * Wp),
                    ((0, 0), (0, 0), (0, Lp - Hp * Wp)))

    # ConvTranspose (stride=1, pad=0) == correlation of the padded input with
    # the spatially flipped kernel.  Pack as (Cout, K*K*Cin_p), tap-major/Cin-minor.
    def flip_pack(Wgt):
        wf = jnp.transpose(jnp.flip(Wgt, axis=(2, 3)), (2, 3, 0, 1))  # (K,K,Cin,Cout)
        wf = jnp.pad(wf, ((0, 0), (0, 0), (0, Cin_p - Cin), (0, 0)))
        return wf.reshape(KKC, -1).T.astype(jnp.float32)              # (Cout, KKC)

    wt_m = flip_pack(Wt)
    wr_m = flip_pack(Wr)
    zt = jnp.zeros((Ct, KKC), jnp.float32)
    zr = jnp.zeros((Cr, KKC), jnp.float32)
    w_pk = jnp.concatenate([
        jnp.concatenate([wt_m, zt], axis=1),          # yt rows  <- patch
        jnp.concatenate([wr_m, zr], axis=1),          # yr rows  <- patch
        jnp.concatenate([zr, wr_m * wr_m], axis=1),   # v  rows  <- patch^2
    ], axis=0)                                        # (Cp, 2*KKC)
    b_pk = jnp.concatenate([bt, br, br * br]).reshape(Cp, 1).astype(jnp.float32)

    # Valid-column mask for the "wide" layout (w < Wo within each row of Wp).
    mask = ((jnp.arange(HWw) % Wp) < Wo).astype(jnp.float32).reshape(1, HWw)

    # ---- Kernel 1: per-batch packed conv matmul --------------------------------
    y = pl.pallas_call(
        partial(_conv_kernel, K=K, Wp=Wp, HWw=HWw, Ct=Ct, Cr=Cr),
        grid=(N,),
        in_specs=[
            pl.BlockSpec((1, Cin_p, Lp), lambda n: (n, 0, 0)),
            pl.BlockSpec((Cp, 2 * KKC), lambda n: (0, 0)),
            pl.BlockSpec((Cp, 1), lambda n: (0, 0)),
            pl.BlockSpec((1, HWw), lambda n: (0, 0)),
        ],
        out_specs=pl.BlockSpec((1, Ctot, HWw), lambda n: (n, 0, 0)),
        out_shape=jax.ShapeDtypeStruct((N, Ctot, HWw), jnp.float32),
        compiler_params=pltpu.CompilerParams(
            dimension_semantics=("parallel",),
            vmem_limit_bytes=32 * 1024 * 1024),
    )(xflat, w_pk, b_pk, mask)

    # ---- Kernel 2: BN + BatchBound + leaky_relu, tiled over channels -----------
    Ctile = 8
    o = pl.pallas_call(
        partial(_norm_bound_kernel, eps=eps, count=N * Ho * Wo,
                n_relu_tiles=Ct // Ctile),
        grid=(Ctot // Ctile,),
        in_specs=[pl.BlockSpec((N, Ctile, HWw), lambda c: (0, c, 0))],
        out_specs=pl.BlockSpec((N, Ctile, HWw), lambda c: (0, c, 0)),
        out_shape=jax.ShapeDtypeStruct((N, Ctot, HWw), jnp.float32),
        compiler_params=pltpu.CompilerParams(
            dimension_semantics=("parallel",),
            vmem_limit_bytes=32 * 1024 * 1024),
    )(y)

    # Drop the wide-layout garbage columns -> NCHW output (N, Ct+Cr, Ho, Wo).
    return o.reshape(N, Ctot, Ho, Wp)[:, :, :, :Wo]


# ----------------------------------------------------------------------------
# Pure-JAX reference (NCHW, mirrors the PyTorch forward) for verification.
# ----------------------------------------------------------------------------
def ref_forward(x_nchw, Wt, bt, Wr, br, *, K):
    def conv_t(x, Wgt, b):
        # conv_transpose2d (stride=1, pad=0) == conv over (K-1)-padded input
        # with the spatially-flipped kernel.
        wf = jnp.transpose(jnp.flip(Wgt, axis=(2, 3)), (1, 0, 2, 3))  # (Cout,Cin,K,K)
        y = lax.conv_general_dilated(
            x, wf, (1, 1), [(K - 1, K - 1), (K - 1, K - 1)],
            dimension_numbers=('NCHW', 'OIHW', 'NCHW'))
        return y + b[None, :, None, None]

    yt = conv_t(x_nchw, Wt, bt)
    z = conv_t(x_nchw, Wr, br) ** 2
    v = conv_t(x_nchw ** 2, Wr ** 2, br ** 2)
    s = z - v

    def bn(y):
        m = jnp.mean(y, axis=(0, 2, 3), keepdims=True)
        var = jnp.mean((y - m) ** 2, axis=(0, 2, 3), keepdims=True)
        return (y - m) / jnp.sqrt(var + 1e-5)

    n1 = bn(yt)
    n2 = bn(s)
    bd = n2 / jnp.max(jnp.abs(n2), axis=0, keepdims=True)
    oc = jnp.concatenate([n1, bd], axis=1)
    return jnp.where(oc >= 0, oc, 0.02 * oc)


if __name__ == "__main__":
    key = jax.random.PRNGKey(0)
    N, Cin, H, W = 2, 4, 16, 16
    Ct, Cr, K = 8, 8, 3          # relu_channels, resqu_channels, kernel_size

    k1, k2, k3, k4, k5 = jax.random.split(key, 5)
    # Deterministic synthetic parameters (ConvTranspose2d weight layout (Cin, Cout, K, K)).
    a_t = 1.0 / math.sqrt(Cin * K * K)
    Wt = jax.random.uniform(k1, (Cin, Ct, K, K), jnp.float32, -a_t, a_t)
    bt = jax.random.uniform(k2, (Ct,), jnp.float32, -a_t, a_t)
    a_r = 0.2 * math.sqrt(6.0 / ((Cin + Cr) * K * K))   # xavier_uniform, gain 0.2
    Wr = jax.random.uniform(k3, (Cin, Cr, K, K), jnp.float32, -a_r, a_r)
    br = jax.random.uniform(k4, (Cr,), jnp.float32, -a_t, a_t)

    x = jax.random.normal(k5, (N, Cin, H, W), jnp.float32)   # NCHW, like PyTorch

    out = split_resqu_conv_transpose(x, Wt, bt, Wr, br, K=K)
    jax.block_until_ready(out)

    ref = ref_forward(x, Wt, bt, Wr, br, K=K)
    assert out.shape == (N, Ct + Cr, H + K - 1, W + K - 1), out.shape
    assert jnp.allclose(out, ref, atol=1e-3, rtol=1e-3), (
        float(jnp.max(jnp.abs(out - ref))))

    print("KERNEL_OK")
</pallas_src>

<mosaic_0001>
module attributes {stable_mosaic.version = 11 : i64} {
  func.func @_conv_kernel(%arg0: i32, %arg1: memref<1x8x512xf32, #tpu.memory_space<vmem>>, %arg2: memref<24x144xf32, #tpu.memory_space<vmem>>, %arg3: memref<24x1xf32, #tpu.memory_space<vmem>>, %arg4: memref<1x360xf32, #tpu.memory_space<vmem>>, %arg5: memref<1x16x360xf32, #tpu.memory_space<vmem>>) attributes {dimension_semantics = [#tpu.dimension_semantics<parallel>], iteration_bounds = array<i64: 2>, scalar_prefetch = 0 : i64, scratch_operands = 0 : i64, tpu.core_type = #tpu.core_type<tc>, window_params = [{transform_indices = @transform_0, window_bounds = array<i64: 1, 8, 512>}, {pipeline_mode = #tpu.pipeline_mode<synchronous>, transform_indices = @transform_1, window_bounds = array<i64: 24, 144>}, {pipeline_mode = #tpu.pipeline_mode<synchronous>, transform_indices = @transform_2, window_bounds = array<i64: 24, 1>}, {pipeline_mode = #tpu.pipeline_mode<synchronous>, transform_indices = @transform_3, window_bounds = array<i64: 1, 360>}, {transform_indices = @transform_4, window_bounds = array<i64: 1, 16, 360>}]} {
    %c0 = arith.constant 0 : index
    %c0_0 = arith.constant 0 : index
    %c0_1 = arith.constant 0 : index
    %0 = vector.load %arg1[%c0, %c0_0, %c0_1] : memref<1x8x512xf32, #tpu.memory_space<vmem>>, vector<1x8x512xf32>
    %1 = vector.shape_cast %0 : vector<1x8x512xf32> to vector<8x512xf32>
    %2 = vector.extract_strided_slice %1 {offsets = [0, 0], sizes = [8, 360], strides = [1, 1]} : vector<8x512xf32> to vector<8x360xf32>
    %3 = vector.extract_strided_slice %1 {offsets = [0, 1], sizes = [8, 360], strides = [1, 1]} : vector<8x512xf32> to vector<8x360xf32>
    %4 = vector.extract_strided_slice %1 {offsets = [0, 2], sizes = [8, 360], strides = [1, 1]} : vector<8x512xf32> to vector<8x360xf32>
    %5 = vector.extract_strided_slice %1 {offsets = [0, 20], sizes = [8, 360], strides = [1, 1]} : vector<8x512xf32> to vector<8x360xf32>
    %6 = vector.extract_strided_slice %1 {offsets = [0, 21], sizes = [8, 360], strides = [1, 1]} : vector<8x512xf32> to vector<8x360xf32>
    %7 = vector.extract_strided_slice %1 {offsets = [0, 22], sizes = [8, 360], strides = [1, 1]} : vector<8x512xf32> to vector<8x360xf32>
    %8 = vector.extract_strided_slice %1 {offsets = [0, 40], sizes = [8, 360], strides = [1, 1]} : vector<8x512xf32> to vector<8x360xf32>
    %9 = vector.extract_strided_slice %1 {offsets = [0, 41], sizes = [8, 360], strides = [1, 1]} : vector<8x512xf32> to vector<8x360xf32>
    %10 = vector.extract_strided_slice %1 {offsets = [0, 42], sizes = [8, 360], strides = [1, 1]} : vector<8x512xf32> to vector<8x360xf32>
    %11 = arith.mulf %2, %2 : vector<8x360xf32>
    %12 = arith.mulf %3, %3 : vector<8x360xf32>
    %13 = arith.mulf %4, %4 : vector<8x360xf32>
    %14 = arith.mulf %5, %5 : vector<8x360xf32>
    %15 = arith.mulf %6, %6 : vector<8x360xf32>
    %16 = arith.mulf %7, %7 : vector<8x360xf32>
    %17 = arith.mulf %8, %8 : vector<8x360xf32>
    %18 = arith.mulf %9, %9 : vector<8x360xf32>
    %19 = arith.mulf %10, %10 : vector<8x360xf32>
    %20 = tpu.concatenate %2, %3, %4, %5, %6, %7, %8, %9, %10, %11, %12, %13, %14, %15, %16, %17 in 0 : vector<8x360xf32>, vector<8x360xf32>, vector<8x360xf32>, vector<8x360xf32>, vector<8x360xf32>, vector<8x360xf32>, vector<8x360xf32>, vector<8x360xf32>, vector<8x360xf32>, vector<8x360xf32>, vector<8x360xf32>, vector<8x360xf32>, vector<8x360xf32>, vector<8x360xf32>, vector<8x360xf32>, vector<8x360xf32> -> vector<128x360xf32>
    %21 = tpu.concatenate %18, %19 in 0 : vector<8x360xf32>, vector<8x360xf32> -> vector<16x360xf32>
    %22 = tpu.concatenate %20, %21 in 0 : vector<128x360xf32>, vector<16x360xf32> -> vector<144x360xf32>
    %c0_2 = arith.constant 0 : index
    %c0_3 = arith.constant 0 : index
    %23 = vector.load %arg2[%c0_2, %c0_3] : memref<24x144xf32, #tpu.memory_space<vmem>>, vector<24x144xf32>
    %cst = arith.constant dense<0.000000e+00> : vector<24x360xf32>
    %24 = tpu.matmul %23, %22, %cst {dimension_numbers = #tpu.dot_dimension_numbers<[1], [0], [0], [1], [0, 0, 1, 1], [], []>} : vector<24x144xf32>, vector<144x360xf32>, vector<24x360xf32> -> vector<24x360xf32>
    %c0_4 = arith.constant 0 : index
    %c0_5 = arith.constant 0 : index
    %25 = vector.load %arg3[%c0_4, %c0_5] : memref<24x1xf32, #tpu.memory_space<vmem>>, vector<24x1xf32>
    %26 = vector.broadcast %25 : vector<24x1xf32> to vector<24x360xf32>
    %27 = arith.addf %24, %26 : vector<24x360xf32>
    %28 = vector.extract_strided_slice %27 {offsets = [0, 0], sizes = [8, 360], strides = [1, 1]} : vector<24x360xf32> to vector<8x360xf32>
    %29 = vector.extract_strided_slice %27 {offsets = [8, 0], sizes = [8, 360], strides = [1, 1]} : vector<24x360xf32> to vector<8x360xf32>
    %30 = vector.extract_strided_slice %27 {offsets = [16, 0], sizes = [8, 360], strides = [1, 1]} : vector<24x360xf32> to vector<8x360xf32>
    %31 = arith.mulf %29, %29 : vector<8x360xf32>
    %32 = arith.subf %31, %30 : vector<8x360xf32>
    %c0_6 = arith.constant 0 : index
    %c0_7 = arith.constant 0 : index
    %33 = vector.load %arg4[%c0_6, %c0_7] : memref<1x360xf32, #tpu.memory_space<vmem>>, vector<1x360xf32>
    %34 = vector.broadcast %33 : vector<1x360xf32> to vector<8x360xf32>
    %35 = arith.mulf %28, %34 : vector<8x360xf32>
    %c0_8 = arith.constant 0 : index
    %c0_9 = arith.constant 0 : index
    %c0_10 = arith.constant 0 : index
    %36 = vector.load %arg5[%c0_8, %c0_9, %c0_10] : memref<1x16x360xf32, #tpu.memory_space<vmem>>, vector<1x8x360xf32>
    %37 = vector.shape_cast %36 : vector<1x8x360xf32> to vector<8x360xf32>
    %38 = vector.shape_cast %35 : vector<8x360xf32> to vector<1x8x360xf32>
    tpu.vector_store %arg5[%c0_8, %c0_9, %c0_10], %38 {strides = array<i32>} : memref<1x16x360xf32, #tpu.memory_space<vmem>>, vector<1x8x360xf32>,
    %39 = vector.broadcast %33 : vector<1x360xf32> to vector<8x360xf32>
    %40 = arith.mulf %32, %39 : vector<8x360xf32>
    %c0_11 = arith.constant 0 : index
    %c8 = arith.constant 8 : index
    %c0_12 = arith.constant 0 : index
    %41 = vector.load %arg5[%c0_11, %c8, %c0_12] : memref<1x16x360xf32, #tpu.memory_space<vmem>>, vector<1x8x360xf32>
    %42 = vector.shape_cast %41 : vector<1x8x360xf32> to vector<8x360xf32>
    %43 = vector.shape_cast %40 : vector<8x360xf32> to vector<1x8x360xf32>
    tpu.vector_store %arg5[%c0_11, %c8, %c0_12], %43 {strides = array<i32>} : memref<1x16x360xf32, #tpu.memory_space<vmem>>, vector<1x8x360xf32>,
    return
  }
  func.func @transform_0(%arg0: i32) -> (i32, i32, i32) {
    %c0_i32 = arith.constant 0 : i32
    %c0_i32_0 = arith.constant 0 : i32
    %c0_i32_1 = arith.constant 0 : i32
    return %arg0, %c0_i32, %c0_i32_0 : i32, i32, i32
  }
  func.func @transform_1(%arg0: i32) -> (i32, i32) {
    %c0_i32 = arith.constant 0 : i32
    %c0_i32_0 = arith.constant 0 : i32
    %c0_i32_1 = arith.constant 0 : i32
    return %c0_i32, %c0_i32_0 : i32, i32
  }
  func.func @transform_2(%arg0: i32) -> (i32, i32) {
    %c0_i32 = arith.constant 0 : i32
    %c0_i32_0 = arith.constant 0 : i32
    %c0_i32_1 = arith.constant 0 : i32
    return %c0_i32, %c0_i32_0 : i32, i32
  }
  func.func @transform_3(%arg0: i32) -> (i32, i32) {
    %c0_i32 = arith.constant 0 : i32
    %c0_i32_0 = arith.constant 0 : i32
    %c0_i32_1 = arith.constant 0 : i32
    return %c0_i32, %c0_i32_0 : i32, i32
  }
  func.func @transform_4(%arg0: i32) -> (i32, i32, i32) {
    %c0_i32 = arith.constant 0 : i32
    %c0_i32_0 = arith.constant 0 : i32
    %c0_i32_1 = arith.constant 0 : i32
    return %arg0, %c0_i32, %c0_i32_0 : i32, i32, i32
  }
}

</mosaic_0001>

<bundles_post_ra>
// kernel: tpu_custom_call.1
= control target key start
LH: loop header
LB: loop body
LE: loop exit
PB: predicated region body
PF: predicated region fallthrough
CT: control target
= control target key end

     0   :  { %9 = vsyncpa [#allocation3], 0  ;;  %s1589_s0 = inlined_call_operand.hbm [shape: f32[2,8,512], index: 0, kind: input, shape index: {}]   ;;  %s1590_s1 = inlined_call_operand.hbm [shape: f32[24,144], index: 1, kind: input, shape index: {}]   ;;  %s1591_s2 = inlined_call_operand.vmem [shape: f32[24,1], index: 2, kind: input, shape index: {}]   ;;  %s1592_s3 = inlined_call_operand.vmem [shape: f32[1,360], index: 3, kind: input, shape index: {}]   ;;  %s1593_s4 = inlined_call_operand.hbm [shape: f32[2,16,360], index: 4, kind: output, shape index: {}]  }
   0x1   :  { %11 = vsyncpa [#allocation3 + $0x1], 0 }
   0x2   :  { %12 = vsyncpa [#allocation6], 0 }
   0x3   :  { %13 = vsyncpa [#allocation4], 0 }
   0x4   :  { %15 = vsyncpa [#allocation4 + $0x1], 0  ;;  %s1245_s15 = smov 0   ;;  %s1247_s16 = smov 0  }
   0x5   :  { %s1249_s17 = smov 0   ;;  %s1251_s18 = smov 0  }
   0x6 LB: > { %s1266_s19 = sadd.s32 4294967295, %s1201_s18   ;;  %s780_s20 = sadd.s32 4294967294, %s1201_s18   ;;  %s1201_s18 = sphi %s1251_s18, %s1613_s18   ;;  %s1197_s17 = sphi %s1249_s17, %s1612_s17   ;;  %s1193_s16 = sphi %s1247_s16, %s1611_s16   ;;  %s1189_s15 = sphi %s1245_s15, %s1610_s15  }
   0x7   : > { %p41_p0 = scmp.ne.s32.totalorder %s1193_s16, %s1189_s15  ;;  %p1594_p1 = scmp.eq.s32.totalorder %s1266_s19, 0 }
   0x8   : > { %p134_p3 = scmp.eq.s32.totalorder %s780_s20, 1  ;;  %p781_p5 = scmp.ge.s32.totalorder %s1201_s18, 1 }
   0x9   : > { %p1275_p4 = por %p1594_p1, %p41_p0  ;;  %p141_p7 = scmp.lt.s32.totalorder %s1201_s18, 3 }
   0xa   : > { %p1280_p6 = por %p134_p3, %p41_p0  ;;  %s1203_s24 = smov [#allocation5]  }
   0xb   : > { %s1597_s21 = scalar_select %p1275_p4, 1, 0 }
   0xc   : > { %s1598_s22 = scalar_select %p1280_p6, 1, 0 }
   0xd   : > { %p1285_p8 = pnand %p781_p5, %p141_p7  ;;  %s153_s25 = sshll.u32 %s1203_s24, 4  ;;  %s1289_s25 = int_to_ptr.vmem [resolvable:$true] %s153_s25 }
   0xe   : > { %s1301_s27 = sadd.s32 1, %s1201_s18   ;;  %s28_s28 = sadd.s32 1, %s1197_s17 }
   0xf   : > { %s1599_s23 = scalar_select %p1285_p8, 1, 0 }
  0x10   : > { %p873_p9 = pneg %p1285_p8  ;;  %s25_s29 = ssub.s32 %s1201_s18, %s1301_s27 }
  0x11   : > { %s1073_s6 = scalar_lea.hbm %s1590_s1, 768 }
  0x12   : > { %p1296_p11 = pnand %p873_p9, %p1594_p1  ;;  %p1074_p12 = scmp.ne.s32.totalorder %s1590_s1, %s1073_s6 }
  0x13   : > { %p1080_p5 = scmp.lt.u32.totalorder %s1073_s6, %s1590_s1 }
  0x14   : > { %p1075_p13 = pneg %p1296_p11 }
  0x16   : > { %p1076_p0 = pnand %p1075_p13, %p1074_p12 }
  0x18   : > { %p1077_p3 = pneg %p1076_p0 }
  0x1a   : > { %p1082_p7 = pnand %p1080_p5, %p1077_p3 }
  0x1c   : > { %1085 = shalt.err (!%p1082_p7)
}
  0x1d   : > { %s1086_s11 = scalar_lea.vmem %s1289_s25, 768  ;;  %p1094_p2 = scmp.lt.s32.totalorder %s1289_s25, %s1289_s25 }
  0x1e   : > { %p1087_p9 = scmp.ne.s32.totalorder %s1289_s25, %s1086_s11  ;;  %p1095_p6 = scmp.lt.s32.totalorder %s1086_s11, %s1086_s11 }
  0x20   : > { %p1089_p10 = pnand %p1087_p9, %p1075_p13  ;;  %p1096_p4 = por %p1095_p6, %p1094_p2 }
  0x22   : > { %p1090_p1 = pneg %p1089_p10 }
  0x24   : > { %p1097_p8 = pnand %p1096_p4, %p1090_p1 }
  0x26   : > { %1100 = shalt.err (!%p1097_p8)
}
  0x27   : > { %s1204_s12 = smov 256   ;;  %s1205_s13 = smov 16  }
  0x28   : > { %876 = dma.hbm_to_vmem [thread:$0]  (!%p1296_p11), %s1590_s1, 768, %s1289_s25, [#allocation6], %s1204_s12, %s1204_s12, %s1205_s13  }
  0x29   : > { %p26_p2 = scmp.eq.s32.totalorder %s25_s29, 0  ;;  %p35_p1 = scmp.ne.s32.totalorder %s1197_s17, %s1193_s16 }
  0x2a   : > { %p36_p4 = scmp.eq.s32.totalorder %s1201_s18, 0  ;;  %p886_p6 = scmp.lt.s32.totalorder %s1201_s18, 2 }
  0x2b   : > { %s1332_s24 = scalar_select %p26_p2, %s1197_s17, %s28_s28  }
  0x2c   : > { %p37_p8 = por %p36_p4, %p35_p1  ;;  %p1601_p10 = scmp.eq.s32.totalorder %s1266_s19, 1 }
  0x2d   : > { %s173_s5 = sand.u32 1, %s1197_s17   ;;  %s799_s6 = sshll.u32 %s1201_s18, 9 }
  0x2e   : > { %p1336_p12 = por %p1601_p10, %p35_p1  ;;  %s784_s7 = sshll.u32 %s173_s5, 5 }
  0x2f   : > { %s1345_s9 = scalar_lea.hbm %s1589_s0, %s799_s6  ;;  %s177_s25 = scalar_lea.vmem [#allocation2], %s784_s7 }
  0x30   : > { %s185_s28 = sshll.u32 %s177_s25, 4  ;;  %p1347_p11 = pnand %p886_p6, %p37_p8  ;;  %s1351_s28 = int_to_ptr.vmem [resolvable:$true] %s185_s28 }
  0x31   : > { %s174_s10 = scalar_lea.sflag [#allocation3], %s173_s5  ;;  %s1101_s11 = scalar_lea.hbm %s1345_s9, 512 }
  0x32   : > { %p1102_p13 = scmp.ne.s32.totalorder %s1345_s9, %s1101_s11  ;;  %p1103_p0 = pneg %p1347_p11 }
  0x33   : > { %s1106_s14 = scalar_lea.hbm %s1589_s0, 1024  ;;  %p1107_p7 = scmp.lt.u32.totalorder %s1345_s9, %s1589_s0 }
  0x34   : > { %p1104_p3 = pnand %p1103_p0, %p1102_p13  ;;  %p1108_p9 = scmp.lt.u32.totalorder %s1106_s14, %s1101_s11 }
  0x35   : > { %p1110_p1 = scmp.lt.u32.totalorder %s1101_s11, %s1345_s9 }
  0x36   : > { %p1105_p5 = pneg %p1104_p3  ;;  %p1109_p2 = por %p1108_p9, %p1107_p7 }
  0x38   : > { %p1111_p4 = por %p1110_p1, %p1109_p2 }
  0x3a   : > { %p1112_p6 = pnand %p1111_p4, %p1105_p5 }
  0x3c   : > { %1115 = shalt.err (!%p1112_p6)
}
  0x3d   : > { %s1116_s5 = scalar_lea.vmem %s1351_s28, 512  ;;  %s1206_s7 = smov [#allocation2]  }
  0x3e   : > { %p1117_p8 = scmp.ne.s32.totalorder %s1351_s28, %s1116_s5  ;;  %s1121_s26 = sshll.u32 %s1206_s7, 4  ;;  %s1122_s26 = int_to_ptr.vmem [resolvable:$false] %s1121_s26 }
  0x3f   : > { %s1123_s8 = scalar_lea.vmem %s1122_s26, 1024  ;;  %p1124_p3 = scmp.lt.s32.totalorder %s1351_s28, %s1122_s26 }
  0x40   : > { %p1119_p10 = pnand %p1117_p8, %p1103_p0  ;;  %p1125_p7 = scmp.lt.s32.totalorder %s1123_s8, %s1116_s5 }
  0x42   : > { %p1120_p13 = pneg %p1119_p10  ;;  %p1126_p9 = por %p1125_p7, %p1124_p3 }
  0x44   : > { %p1127_p2 = pnand %p1126_p9, %p1120_p13 }
  0x46   : > { %1130 = shalt.err (!%p1127_p2)
}
  0x47   : > { %880 = dma.hbm_to_vmem [thread:$0]  (!%p1347_p11), %s1345_s9, 512, %s1351_s28, %s174_s10  }
  0x48   : > { %p1604_p5 = scmp.ne.s32.totalorder %s1599_s23, 0 }
  0x49   : > { %s1381_s25 = sand.u32 (!%p1604_p5), 1, %s1193_s16   ;;  %p1605_p0 = scmp.ne.s32.totalorder (!%p1604_p5), %s1597_s21, 0 }
  0x4a   : > { %194 = sbr.rel (%p1604_p5) target bundleno = 583 (0x247), region = 36  ;;  %s788_s11 = sshll.u32 (!%p1604_p5), %s1381_s25, 5 }
  0x4b   : > { %s197_s12 = scalar_lea.sflag (!%p1604_p5), [#allocation3], %s1381_s25  ;;  %s200_s13 = scalar_lea.vmem (!%p1604_p5), [#allocation2], %s788_s11 }
  0x51   : > { %1176 = dma.done.wait (%p1605_p0), %s197_s12, 512  }
  0x52   : > { %1178 = vsyncadd (%p1605_p0), %s197_s12, 4294966784  ;;  %p1606_p1 = scmp.eq.s32.totalorder %s1266_s19, 0 }
  0x54   : > { %1180 = dma.done.wait (%p1606_p1), [#allocation6], 768   ;;  %p1607_p11 = pmov %p1606_p1 }
  0x55   : > { %v1393_v0 = vld [vmem:[%s200_s13 + $0x8] sm:$0xff]  ;;  %v231_v1 = vld [vmem:[%s200_s13 + $0x10] sm:$0xff]  ;;  %v1395_v2 = vld [vmem:[%s200_s13] sm:$0xff]  ;;  %s1207_s21 = smov 127   ;;  %s1208_s23 = smov 108   ;;  %v1210_v12 = vmov 0.0|0.0  }
  0x56   : > { %1182 = vsyncadd (%p1607_p11), [#allocation6], 4294966528  ;;  %v946_v3 = vpack.i.bf16 %v231_v1, %v1393_v0  ;;  %v1400_v4 = vmul.f32 %v1393_v0, %v1393_v0  ;;  %v1402_v5 = vmul.f32 %v231_v1, %v231_v1  ;;  %v232_v6 = vld [vmem:[%s200_s13 + $0x18] sm:$0xff]  ;;  %v1406_v7 = vmul.f32 %v1395_v2, %v1395_v2  ;;  %s1209_s9 = smov 126   ;;  %836 = vmatprep.subr.bf16.mxu1 %v1210_v12  ;;  %s1211_s28 = smov 106   ;;  %v451_v29 = vld [vmem:[#allocation5 + $0x8] sm:$0xff] }
  0x57   : > { %v1408_v8 = vmul.f32 %v232_v6, %v232_v6  ;;  %s1212_s29 = smov 107   ;;  %s1213_s10 = smov 87   ;;  %v1006_v13 = vpack.i.bf16 %v232_v6, %v1395_v2  ;;  %vm246_vm0 = vcmask 1039360   ;;  %vm474_vm1 = vcmask 130048   ;;  %v458_v63 = vld [vmem:[%s1591_s2 + $0x10] sm:$0xff] }
  0x58   : > { %947 = vrot.lane.b32.xlu1 %v946_v3, %s1207_s21  ;;  %v936_v9 = vpack.i.bf16 %v1402_v5, %v1400_v4  ;;  %v966_v11 = vpack.i.bf16 %v1400_v4, %v1395_v2  ;;  %s1214_s14 = smov 88   ;;  %s1215_s20 = smov 86   ;;  %v1026_v14 = vpack.i.bf16 %v1406_v7, %v1402_v5  ;;  %790 = vmatprep.mubr.msk.f32.mxu0 %vm474_vm1, %v451_v29  ;;  %vm270_vm2 = vcmask 883712  }
  0x59   : > { %v941_v10 = vpack.i.bf16 %v1406_v7, %v1408_v8  ;;  %v1046_v15 = vpack.i.bf16 %v1408_v8, %v1406_v7  ;;  %793 = vmatprep.mubr.msk.f32.mxu1 %vm474_vm1, %v451_v29  ;;  %vm258_vm3 = vcmask 1031168   ;;  %vm294_vm4 = vcmask 867328   ;;  %s1217_s6 = smov [#allocation7]  }
  0x5a   : > { %937 = vrot.lane.b32.xlu0 %v936_v9, %s1207_s21  ;;  %vm282_vm5 = vcmask 875520   ;;  %v1216_v6 = vmov 0   ;;  %vm324_vm6 = vcmask 711680   ;;  %vm309_vm7 = vcmask 719872   ;;  %s1135_s5 = sshll.u32 %s1217_s6, 4  ;;  %s1136_s5 = int_to_ptr.vmem [resolvable:$false] %s1135_s5 }
  0x5b   : > { %1072 = vset.pattern.permute.xlu1 %v1216_v6  ;;  %1071 = vset.pattern.permute.xlu0 %v1216_v6  ;;  %vm339_vm8 = vcmask 703488   ;;  %vm675_vm9 = vcmask 850944   ;;  %s1137_s7 = scalar_lea.vmem %s1136_s5, 1536 }
  0x5c   : > { %240 = vrot.lane.b32.xlu1 %v1395_v2, %s1207_s21 }
  0x5e   : > { %942 = vrot.lane.b32.xlu0 %v941_v10, %s1207_s21  ;;  %s863_s21 = smul.u32 48, %s1381_s25 }
  0x60   : > { %957 = vrot.lane.b32.xlu1 %v946_v3, %s1208_s23 }
  0x62   : > { %952 = vrot.lane.b32.xlu0 %v946_v3, %s1209_s9 }
  0x64   : > { %967 = vrot.lane.b32.xlu1 %v966_v11, %s1208_s23 }
  0x66   : > { %962 = vrot.lane.b32.xlu0 %v966_v11, %s1209_s9 }
  0x68   : > { %977 = vrot.lane.b32.xlu1 %v946_v3, %s1211_s28 }
  0x6a   : > { %972 = vrot.lane.b32.xlu0 %v946_v3, %s1212_s29 }
  0x6c   : > { %987 = vrot.lane.b32.xlu1 %v966_v11, %s1211_s28 }
  0x6e   : > { %982 = vrot.lane.b32.xlu0 %v966_v11, %s1212_s29 }
  0x70   : > { %997 = vrot.lane.b32.xlu1 %v946_v3, %s1213_s10 }
  0x72   : > { %992 = vrot.lane.b32.xlu0 %v946_v3, %s1214_s14 }
  0x74   : > { %1007 = vrot.lane.b32.xlu1 %v1006_v13, %s1213_s10 }
  0x76   : > { %1002 = vrot.lane.b32.xlu0 %v1006_v13, %s1214_s14 }
  0x78   : > { %1017 = vrot.lane.b32.xlu1 %v1006_v13, %s1215_s20  ;;  %v456_v13 = vld [vmem:[%s1591_s2] sm:$0xff] }
  0x7a   : > { %1012 = vrot.lane.b32.xlu0 %v946_v3, %s1215_s20 }
  0x7c   : > { %1027 = vrot.lane.b32.xlu1 %v1026_v14, %s1208_s23  ;;  %s1528_s23 = scalar_lea.vmem [#allocation7], %s863_s21 }
  0x7e   : > { %1022 = vrot.lane.b32.xlu0 %v1026_v14, %s1209_s9  ;;  %s697_s9 = sshll.u32 %s1528_s23, 4  ;;  %s1536_s9 = int_to_ptr.vmem [resolvable:$true] %s697_s9 }
  0x7f   : > { %s1131_s20 = scalar_lea.vmem %s1536_s9, 768  ;;  %p1138_p10 = scmp.lt.s32.totalorder %s1536_s9, %s1136_s5 }
  0x80   : > { %1037 = vrot.lane.b32.xlu1 %v1026_v14, %s1211_s28  ;;  %s864_s28 = smul.u32 768, %s1266_s19  ;;  %s684_s19 = scalar_lea.sflag [#allocation4], %s1381_s25 }
  0x81   : > { %p1132_p4 = scmp.ne.s32.totalorder %s1536_s9, %s1131_s20  ;;  %p1139_p13 = scmp.lt.s32.totalorder %s1137_s7, %s1131_s20 }
  0x82   : > { %1032 = vrot.lane.b32.xlu0 %v1026_v14, %s1212_s29 }
  0x83   : > { %p1133_p6 = pnand %p1132_p4, %p1336_p12  ;;  %p1140_p3 = por %p1139_p13, %p1138_p10 }
  0x84   : > { %1047 = vrot.lane.b32.xlu1 %v1046_v15, %s1214_s14 }
  0x85   : > { %p1134_p8 = pneg %p1133_p6 }
  0x86   : > { %1042 = vrot.lane.b32.xlu0 %v936_v9, %s1214_s14  ;;  %s1542_s14 = scalar_lea.hbm %s1593_s4, %s864_s28 }
  0x87   : > { %p1141_p7 = pnand %p1140_p3, %p1134_p8 }
  0x8a   : > { %1052 = vrot.lane.b32.xlu0 %v936_v9, %s1213_s10 }
  0xca   : > { %v948_v16 = vpop.permute.xlu1 %947 }
  0xcb   : > { %v950_v17 = vunpack.i.h.bf16 %v948_v16  ;;  %v949_v18 = vunpack.i.l.bf16 %v948_v16 }
  0xcc   : > { %v938_v19 = vpop.permute.xlu0 %937 }
  0xcd   : > { %v248_v20 = vsel %vm246_vm0, %v949_v18, %v950_v17  ;;  %v837_v21 = vpack.c.bf16 %v950_v17, %v231_v1  ;;  %v1429_v25 = vunpack.i.h.bf16 %v938_v19  ;;  %v939_v26 = vunpack.i.l.bf16 %v938_v19 }
  0xce   : > { %v241_v22 = vpop.permute.xlu1 %240  ;;  %v800_v23 = vpack.c.bf16 %v248_v20, %v1393_v0  ;;  %v457_v0 = vld [vmem:[%s1591_s2 + $0x8] sm:$0xff] }
  0xcf   : > { %v247_v24 = vsel %vm246_vm0, %v241_v22, %v949_v18  ;;  %838 = vmatpush1.bf16.msra.mxu1 %v837_v21  ;;  %v1442_v38 = vsel %vm246_vm0, %v939_v26, %v1429_v25 }
  0xd0   : > { %v943_v27 = vpop.permute.xlu0 %942  ;;  %801 = vmatprep.subr.bf16.mxu0 %v800_v23  ;;  %v802_v28 = vpack.c.bf16 %v247_v24, %v1395_v2  ;;  %839 = vmatprep.subr.bf16.mxu1 %v1210_v12 }
  0xd1   : > { %v945_v30 = vunpack.i.h.bf16 %v943_v27  ;;  %v944_v31 = vunpack.i.l.bf16 %v943_v27 }
  0xd2   : > { %v958_v32 = vpop.permute.xlu1 %957  ;;  %803 = vmatpush1.bf16.msra.mxu0 %v802_v28 }
  0xd3   : > { %v960_v33 = vunpack.i.h.bf16 %v958_v32  ;;  %v959_v34 = vunpack.i.l.bf16 %v958_v32  ;;  %v1436_v35 = vsel %vm246_vm0, %v945_v30, %v939_v26  ;;  %v421_v39 = vsel %vm246_vm0, %v1429_v25, %v944_v31 }
  0xd4   : > { %v953_v36 = vpop.permute.xlu0 %952  ;;  %v1061_v37 = vpack.i.bf16 %v1436_v35, %v1406_v7  ;;  %v1056_v42 = vpack.i.bf16 %v421_v39, %v1442_v38  ;;  %v1066_v50 = vpack.i.bf16 %v944_v31, %v1408_v8 }
  0xd5   : > { %v955_v40 = vunpack.i.h.bf16 %v953_v36  ;;  %v954_v41 = vunpack.i.l.bf16 %v953_v36  ;;  %v272_v43 = vsel %vm270_vm2, %v959_v34, %v960_v33 }
  0xd6   : > { %1062 = vrot.lane.b32.xlu0 %v1061_v37, %s1213_s10  ;;  %v1449_v44 = vpop.permute.xlu1 %967  ;;  %1057 = vrot.lane.b32.xlu1 %v1056_v42, %s1213_s10 }
  0xd7   : > { %v840_v45 = vpack.c.bf16 %v960_v33, %v955_v40  ;;  %v969_v46 = vunpack.i.l.bf16 %v1449_v44  ;;  %v260_v47 = vsel %vm258_vm3, %v954_v41, %v955_v40 }
  0xd8   : > { %v1454_v48 = vpop.permute.xlu0 %962  ;;  %v804_v49 = vpack.c.bf16 %v272_v43, %v260_v47  ;;  %v970_v47 = vunpack.i.h.bf16 %v1449_v44 }
  0xd9   : > { %v964_v51 = vunpack.i.l.bf16 %v1454_v48  ;;  %841 = vmatpush1.bf16.msra.mxu1 %v840_v45  ;;  %v271_v52 = vsel %vm270_vm2, %v969_v46, %v959_v34 }
  0xda   : > { %v978_v53 = vpop.permute.xlu1 %977  ;;  %805 = vmatprep.subr.bf16.mxu0 %v804_v49  ;;  %842 = vmatprep.subr.bf16.mxu1 %v1210_v12  ;;  %v965_v49 = vunpack.i.h.bf16 %v1454_v48 }
  0xdb   : > { %1067 = vrot.lane.b32.xlu1 %v1066_v50, %s1213_s10  ;;  %v980_v54 = vunpack.i.h.bf16 %v978_v53  ;;  %v979_v55 = vunpack.i.l.bf16 %v978_v53  ;;  %v259_v56 = vsel %vm258_vm3, %v964_v51, %v954_v41  ;;  %466 = vperm.xlu0 %1071, %v457_v0  }
  0xdc   : > { %v973_v57 = vpop.permute.xlu0 %972  ;;  %v806_v58 = vpack.c.bf16 %v271_v52, %v259_v56 }
  0xdd   : > { %v975_v59 = vunpack.i.h.bf16 %v973_v57  ;;  %v974_v60 = vunpack.i.l.bf16 %v973_v57  ;;  %v296_v61 = vsel %vm294_vm4, %v979_v55, %v980_v54 }
  0xde   : > { %v1463_v62 = vpop.permute.xlu1 %987  ;;  %807 = vmatpush1.bf16.msra.mxu0 %v806_v58 }
  0xdf   : > { %v843_v1 = vpack.c.bf16 %v980_v54, %v975_v59  ;;  %v989_v2 = vunpack.i.l.bf16 %v1463_v62  ;;  %v284_v3 = vsel %vm282_vm5, %v974_v60, %v975_v59  ;;  %471 = vperm.xlu1 %1072, %v458_v63   ;;  %v990_v48 = vunpack.i.h.bf16 %v1463_v62 }
  0xe0   : > { %v1473_v8 = vpop.permute.xlu0 %982  ;;  %v808_v9 = vpack.c.bf16 %v296_v61, %v284_v3 }
  0xe1   : > { %v984_v10 = vunpack.i.l.bf16 %v1473_v8  ;;  %844 = vmatpush1.bf16.msra.mxu1 %v843_v1  ;;  %v295_v11 = vsel %vm294_vm4, %v989_v2, %v979_v55  ;;  %v985_v63 = vunpack.i.h.bf16 %v1473_v8 }
  0xe2   : > { %v998_v14 = vpop.permute.xlu1 %997  ;;  %809 = vmatprep.subr.bf16.mxu0 %v808_v9  ;;  %845 = vmatprep.subr.bf16.mxu1 %v1210_v12 }
  0xe3   : > { %v1000_v15 = vunpack.i.h.bf16 %v998_v14  ;;  %v999_v16 = vunpack.i.l.bf16 %v998_v14  ;;  %v283_v17 = vsel %vm282_vm5, %v984_v10, %v974_v60  ;;  %461 = vperm.xlu1 %1072, %v456_v13  }
  0xe4   : > { %v993_v18 = vpop.permute.xlu0 %992  ;;  %v810_v19 = vpack.c.bf16 %v295_v11, %v283_v17 }
  0xe5   : > { %v995_v20 = vunpack.i.h.bf16 %v993_v18  ;;  %v994_v21 = vunpack.i.l.bf16 %v993_v18  ;;  %v326_v22 = vsel %vm324_vm6, %v999_v16, %v1000_v15 }
  0xe6   : > { %v1008_v23 = vpop.permute.xlu1 %1007  ;;  %811 = vmatpush1.bf16.msra.mxu0 %v810_v19 }
  0xe7   : > { %v1010_v24 = vunpack.i.h.bf16 %v1008_v23  ;;  %v1009_v26 = vunpack.i.l.bf16 %v1008_v23  ;;  %v311_v27 = vsel %vm309_vm7, %v994_v21, %v995_v20 }
  0xe8   : > { %v1003_v28 = vpop.permute.xlu0 %1002  ;;  %v812_v29 = vpack.c.bf16 %v326_v22, %v311_v27 }
  0xe9   : > { %v1005_v30 = vunpack.i.h.bf16 %v1003_v28  ;;  %v1004_v31 = vunpack.i.l.bf16 %v1003_v28  ;;  %v327_v32 = vsel %vm324_vm6, %v1000_v15, %v1010_v24  ;;  %v325_v33 = vsel %vm324_vm6, %v1009_v26, %v999_v16 }
  0xea   : > { %v1018_v34 = vpop.permute.xlu1 %1017  ;;  %813 = vmatprep.subr.bf16.mxu0 %v812_v29 }
  0xeb   : > { %v1020_v36 = vunpack.i.h.bf16 %v1018_v34  ;;  %v1019_v37 = vunpack.i.l.bf16 %v1018_v34  ;;  %v312_v39 = vsel %vm309_vm7, %v995_v20, %v1005_v30  ;;  %v310_v40 = vsel %vm309_vm7, %v1004_v31, %v994_v21 }
  0xec   : > { %v1013_v41 = vpop.permute.xlu0 %1012  ;;  %v846_v42 = vpack.c.bf16 %v327_v32, %v312_v39  ;;  %v814_v43 = vpack.c.bf16 %v325_v33, %v310_v40 }
  0xed   : > { %v1015_v45 = vunpack.i.h.bf16 %v1013_v41  ;;  %v1014_v46 = vunpack.i.l.bf16 %v1013_v41 }
  0xee   : > { %847 = vmatpush1.bf16.msra.mxu1 %v846_v42  ;;  %815 = vmatpush1.bf16.msra.mxu0 %v814_v43  ;;  %v1028_v50 = vpop.permute.xlu1 %1027 }
  0xef   : > { %848 = vmatprep.subr.bf16.mxu1 %v1210_v12  ;;  %v341_v51 = vsel %vm339_vm8, %v1014_v46, %v1015_v45  ;;  %v342_v52 = vsel %vm339_vm8, %v1015_v45, %v1020_v36  ;;  %v340_v53 = vsel %vm339_vm8, %v1019_v37, %v1014_v46  ;;  %v1030_v54 = vunpack.i.h.bf16 %v1028_v50 }
  0xf0   : > { %v1023_v55 = vpop.permute.xlu0 %1022  ;;  %v816_v56 = vpack.c.bf16 %v1400_v4, %v341_v51  ;;  %v849_v57 = vpack.c.bf16 %v1402_v5, %v342_v52  ;;  %v818_v58 = vpack.c.bf16 %v1406_v7, %v340_v53  ;;  %v1029_v59 = vunpack.i.l.bf16 %v1028_v50  ;;  %v450_v50 = vld [vmem:[#allocation5] sm:$0xff] }
  0xf1   : > { %v1025_v44 = vunpack.i.h.bf16 %v1023_v55  ;;  %v1024_v60 = vunpack.i.l.bf16 %v1023_v55  ;;  %v377_v3 = vsel %vm270_vm2, %v1030_v54, %v970_v47  ;;  %v453_v54 = vld [vmem:[#allocation5 + $0x18] sm:$0xff]  ;;  %v452_v55 = vld [vmem:[#allocation5 + $0x10] sm:$0xff] }
  0xf2   : > { %817 = vmatprep.subr.bf16.mxu0 %v816_v56  ;;  %850 = vmatpush1.bf16.msra.mxu1 %v849_v57  ;;  %v1038_v61 = vpop.permute.xlu1 %1037  ;;  %v378_v62 = vsel %vm270_vm2, %v970_v47, %v1029_v59  ;;  %v455_v56 = vld [vmem:[#allocation5 + $0x28] sm:$0xff]  ;;  %v454_v57 = vld [vmem:[#allocation5 + $0x20] sm:$0xff] }
  0xf3   : > { %v852_v0 = vpack.c.bf16 %v1024_v60, %v1429_v25  ;;  %819 = vmatpush1.bf16.msra.mxu0 %v818_v58  ;;  %851 = vmatprep.subr.bf16.mxu1 %v1210_v12  ;;  %v367_v4 = vsel %vm258_vm3, %v965_v49, %v1024_v60  ;;  %v366_v5 = vsel %vm258_vm3, %v1025_v44, %v965_v49  ;;  %v1040_v9 = vunpack.i.h.bf16 %v1038_v61 }
  0xf4   : > { %v820_v7 = vpack.c.bf16 %v367_v4, %v1442_v38  ;;  %v822_v1 = vpack.c.bf16 %v366_v5, %v1436_v35  ;;  %v1033_v2 = vpop.permute.xlu0 %1032  ;;  %v1039_v25 = vunpack.i.l.bf16 %v1038_v61  ;;  %v655_v58 = vlaneseq }
  0xf5   : > { %v1035_v6 = vunpack.i.h.bf16 %v1033_v2  ;;  %v1034_v8 = vunpack.i.l.bf16 %v1033_v2  ;;  %v399_v21 = vsel %vm294_vm4, %v1040_v9, %v990_v48 }
  0xf6   : > { %821 = vmatprep.subr.bf16.mxu0 %v820_v7  ;;  %853 = vmatpush1.bf16.msra.mxu1 %v852_v0  ;;  %v1048_v10 = vpop.permute.xlu1 %1047  ;;  %v400_v20 = vsel %vm294_vm4, %v990_v48, %v1039_v25  ;;  %v653_v48 = vld [vmem:[%s1592_s3] sm:$0x7] }
  0xf7   : > { %823 = vmatpush1.bf16.msra.mxu0 %v822_v1  ;;  %v855_v11 = vpack.c.bf16 %v1034_v8, %v1029_v59  ;;  %v389_v13 = vsel %vm282_vm5, %v985_v63, %v1034_v8  ;;  %v388_v38 = vsel %vm282_vm5, %v1035_v6, %v985_v63  ;;  %v1050_v14 = vunpack.i.h.bf16 %v1048_v10  ;;  %854 = vmatprep.subr.bf16.mxu1 %v1210_v12 }
  0xf8   : > { %v824_v35 = vpack.c.bf16 %v389_v13, %v378_v62  ;;  %v826_v15 = vpack.c.bf16 %v388_v38, %v377_v3  ;;  %v1043_v16 = vpop.permute.xlu0 %1042  ;;  %v1049_v17 = vunpack.i.l.bf16 %v1048_v10  ;;  %v656_v59 = vshrl.u32 %v655_v58, 7 }
  0xf9   : > { %v1045_v18 = vunpack.i.h.bf16 %v1043_v16  ;;  %v1044_v19 = vunpack.i.l.bf16 %v1043_v16 }
  0xfa   : > { %825 = vmatprep.subr.bf16.mxu0 %v824_v35  ;;  %856 = vmatpush1.bf16.msra.mxu1 %v855_v11  ;;  %v657_v60 = vsub.s32 0, %v656_v59  ;;  %v661_v61 = vsub.s32 1, %v656_v59  ;;  %v665_v0 = vsub.s32 2, %v656_v59 }
  0xfb   : > { %827 = vmatpush1.bf16.msra.mxu0 %v826_v15  ;;  %v414_v22 = vsel %vm309_vm7, %v1044_v19, %v1045_v18  ;;  %v413_v23 = vsel %vm309_vm7, %v1049_v17, %v1044_v19  ;;  %857 = vmatprep.subr.bf16.mxu1 %v1210_v12  ;;  %v415_v24 = vsel %vm309_vm7, %v1045_v18, %v1050_v14 }
  0xfc   : > { %v828_v26 = vpack.c.bf16 %v414_v22, %v400_v20  ;;  %v830_v27 = vpack.c.bf16 %v413_v23, %v399_v21  ;;  %v858_v28 = vpack.c.bf16 %v415_v24, %v1039_v25  ;;  %v1053_v29 = vpop.permute.xlu0 %1052  ;;  %v658_v4 = vrot.slane %v653_v48, %v657_v60 }
  0xfd   : > { %v1055_v30 = vunpack.i.h.bf16 %v1053_v29  ;;  %v1054_v31 = vunpack.i.l.bf16 %v1053_v29  ;;  %v662_v7 = vrot.slane %v653_v48, %v661_v61  ;;  %v666_v3 = vrot.slane %v653_v48, %v665_v0 }
  0xfe   : > { %829 = vmatprep.subr.bf16.mxu0 %v828_v26  ;;  %859 = vmatpush1.bf16.msra.mxu1 %v858_v28 }
  0xff   : > { %831 = vmatpush1.bf16.msra.mxu0 %v830_v27  ;;  %860 = vmatprep.subr.bf16.mxu1 %v1210_v12  ;;  %v439_v40 = vsel %vm324_vm6, %v1054_v31, %v1055_v30 }
 0x148   : > { %v1063_v32 = vpop.permute.xlu0 %1062  ;;  %v1058_v36 = vpop.permute.xlu1 %1057 }
 0x149   : > { %v1065_v33 = vunpack.i.h.bf16 %v1063_v32  ;;  %v1064_v34 = vunpack.i.l.bf16 %v1063_v32  ;;  %v1060_v37 = vunpack.i.h.bf16 %v1058_v36  ;;  %v1059_v39 = vunpack.i.l.bf16 %v1058_v36 }
 0x14b   : > { %v438_v41 = vsel %vm324_vm6, %v1064_v34, %v1054_v31  ;;  %v442_v42 = vsel %vm324_vm6, %v1059_v39, %v1060_v37  ;;  %v441_v43 = vsel %vm324_vm6, %v1065_v33, %v1059_v39 }
 0x14c   : > { %v832_v46 = vpack.c.bf16 %v442_v42, %v439_v40  ;;  %v834_v12 = vpack.c.bf16 %v441_v43, %v438_v41 }
 0x14d   : > { %v1068_v45 = vpop.permute.xlu1 %1067 }
 0x14e   : > { %v1070_v47 = vunpack.i.h.bf16 %v1068_v45  ;;  %v1069_v49 = vunpack.i.l.bf16 %v1068_v45  ;;  %833 = vmatprep.subr.bf16.mxu0 %v832_v46 }
 0x14f   : > { %835 = vmatpush1.bf16.msra.mxu0 %v834_v12 }
 0x150   : > { %v440_v51 = vsel %vm324_vm6, %v1055_v30, %v1069_v49  ;;  %v443_v52 = vsel %vm324_vm6, %v1060_v37, %v1070_v47 }
 0x151   : > { %v861_v53 = vpack.c.bf16 %v443_v52, %v440_v51 }
 0x152   : > { %549 = vmatmul.mubr.f32.vlgmr.msra.gmra.mrb[0].mxu0 %v450_v50 }
 0x153   : > { %862 = vmatpush1.bf16.msra.mxu1 %v861_v53  ;;  %791 = vmatprep.mubr.msk.f32.mxu0 %vm474_vm1, %v453_v54 }
 0x156   : > { %632 = vmatmul.mubr.f32.vlgmr.msra.gmra.mrb[0].mxu1 %v450_v50  ;;  %555 = vmatmul.mubr.f32.gmra.mrb[2].mxu0 %v452_v55 }
 0x157   : > { %794 = vmatprep.mubr.msk.f32.mxu1 %vm474_vm1, %v453_v54  ;;  %792 = vmatprep.mubr.msk.f32.mxu0 %vm474_vm1, %v455_v56 }
 0x15a   : > { %637 = vmatmul.mubr.f32.gmra.mrb[2].mxu1 %v452_v55  ;;  %561 = vmatmul.mubr.f32.gmra.mrb[4].mxu0 %v454_v57  ;;  %v467_v6 = vpop.permute.xlu0 %466 }
 0x15b   : > { %795 = vmatprep.mubr.msk.f32.mxu1 %vm474_vm1, %v455_v56 }
 0x15e   : > { %642 = vmatmul.mubr.f32.gmra.mrb[4].mxu1 %v454_v57  ;;  %v472_v44 = vpop.permute.xlu1 %471 }
 0x162   : > { %v462_v63 = vpop.permute.xlu1 %461 }
 0x225   : > { %v550_v5 = vpop.f32.mrb[0].mxu0 }
 0x226   : > { %v552_v1 = vpop.f32.mrb[1].mxu0  ;;  %v551_v2 = vadd.f32 %v550_v5, %v462_v63 }
 0x227   : > { %v553_v62 = vadd.f32 %v552_v1, %v462_v63 }
 0x228   : > { %v670_v8 = vmul.f32 %v658_v4, %v551_v2 }
 0x229   : > { %v633_v9 = vpop.f32.mrb[0].mxu1  ;;  %v671_v25 = vmul.f32 %v662_v7, %v553_v62  ;;  %v556_v13 = vpop.f32.mrb[2].mxu0 }
 0x22a   : > { %v634_v10 = vadd.f32 %v633_v9, %v462_v63  ;;  %v635_v11 = vpop.f32.mrb[1].mxu1  ;;  %673 = vst [vmem:[%s1528_s23] sm:$0xff] %v670_v8  ;;  %v557_v38 = vadd.f32 %v556_v13, %v467_v6  ;;  %v558_v14 = vpop.f32.mrb[3].mxu0 }
 0x22b   : > { %674 = vst [vmem:[%s1528_s23 + $0x8] sm:$0xff] %v671_v25  ;;  %v559_v15 = vadd.f32 %v558_v14, %v467_v6 }
 0x22c   : > { %v672_v35 = vmul.f32 %v666_v3, %v634_v10  ;;  %v647_v16 = vmul.f32 %v557_v38, %v557_v38 }
 0x22d   : > { %v638_v17 = vpop.f32.mrb[2].mxu1  ;;  %v648_v18 = vmul.f32 %v559_v15, %v559_v15  ;;  %v562_v20 = vpop.f32.mrb[4].mxu0 }
 0x22e   : > { %676 = vst.msk [vmem:[%s1528_s23 + $0x10] sm:$0xff] %vm675_vm9, %v672_v35  ;;  %v639_v19 = vadd.f32 %v638_v17, %v467_v6  ;;  %v640_v21 = vpop.f32.mrb[3].mxu1  ;;  %v563_v22 = vadd.f32 %v562_v20, %v472_v44  ;;  %v564_v23 = vpop.f32.mrb[5].mxu0 }
 0x22f   : > { %v565_v24 = vadd.f32 %v564_v23, %v472_v44 }
 0x230   : > { %v650_v26 = vsub.f32 %v647_v16, %v563_v22  ;;  %v649_v28 = vmul.f32 %v639_v19, %v639_v19 }
 0x231   : > { %v643_v27 = vpop.f32.mrb[4].mxu1  ;;  %v651_v29 = vsub.f32 %v648_v18, %v565_v24 }
 0x232   : > { %v644_v30 = vadd.f32 %v643_v27, %v472_v44  ;;  %v645_v31 = vpop.f32.mrb[5].mxu1  ;;  %v677_v32 = vmul.f32 %v658_v4, %v650_v26 }
 0x233   : > { %v678_v33 = vmul.f32 %v662_v7, %v651_v29 }
 0x234   : > { %v652_v34 = vsub.f32 %v649_v28, %v644_v30  ;;  %680 = vst [vmem:[%s1528_s23 + $0x18] sm:$0xff] %v677_v32 }
 0x235   : > { %681 = vst [vmem:[%s1528_s23 + $0x20] sm:$0xff] %v678_v33 }
 0x236   : > { %v679_v36 = vmul.f32 %v666_v3, %v652_v34 }
 0x238   : > { %682 = vst.msk [vmem:[%s1528_s23 + $0x28] sm:$0xff] %vm675_vm9, %v679_v36 }
 0x239   : > { %1144 = shalt.err (!%p1141_p7)
}
 0x23a   : > { %s1145_s26 = scalar_lea.hbm %s1542_s14, 768  ;;  %s1149_s12 = scalar_lea.hbm %s1593_s4, 1536 }
 0x23b   : > { %p1146_p9 = scmp.ne.s32.totalorder %s1542_s14, %s1145_s26  ;;  %p1150_p0 = scmp.lt.u32.totalorder %s1542_s14, %s1593_s4 }
 0x23c   : > { %p1151_p1 = scmp.lt.u32.totalorder %s1149_s12, %s1145_s26  ;;  %p1153_p4 = scmp.lt.u32.totalorder %s1145_s26, %s1542_s14 }
 0x23d   : > { %p1147_p2 = pnand %p1146_p9, %p1336_p12 }
 0x23e   : > { %p1152_p11 = por %p1151_p1, %p1150_p0 }
 0x23f   : > { %p1148_p5 = pneg %p1147_p2 }
 0x240   : > { %p1154_p6 = por %p1153_p4, %p1152_p11 }
 0x242   : > { %p1155_p8 = pnand %p1154_p6, %p1148_p5 }
 0x244   : > { %1158 = shalt.err (!%p1155_p8)
}
 0x245   : > { %s1218_s23 = smov 384   ;;  %s1219_s28 = smov 24  }
 0x246   : > { %871 = dma.vmem_to_hbm [thread:$0]  (%p1336_p12), %s1536_s9, 768, %s1542_s14, %s684_s19, %s1218_s23, %s1218_s23, %s1219_s28  }
 0x247 PF: > { %s712_s29 = sand.u32 1, %s1189_s15   ;;  %p1608_p10 = scmp.ne.s32.totalorder %s1598_s22, 0 }
 0x248   : > { %p1609_p13 = scmp.ge.s32.totalorder %s1201_s18, 2  ;;  %s713_s10 = scalar_lea.sflag [#allocation4], %s712_s29 }
 0x24a   : > { %p882_p3 = pnand %p1609_p13, %p1608_p10 }
 0x24c   : > { %1184 = dma.done.wait (!%p882_p3), %s713_s10, 768  }
 0x24d   : > { %1186 = vsyncadd (!%p882_p3), %s713_s10, 4294966528  ;;  %p18_p7 = scmp.ge.s32.totalorder %s1301_s27, 4   ;;  %s1610_s15 = smov %s1193_s16 }
 0x24e   : > { %s1611_s16 = smov %s1197_s17  ;;  %s1612_s17 = smov %s1332_s24 }
 0x24f   : > { %s1613_s18 = smov %s1301_s27  ;;  %20 = sbr.rel (!%p18_p7) target bundleno = 6 (0x6), region = 85 }
 0x256   :  { %718 = vsyncpa [#allocation3], 1 }
 0x257   :  { %720 = vsyncpa [#allocation3 + $0x1], 1 }
 0x258   :  { %721 = vsyncpa [#allocation6], 1 }
 0x259   :  { %722 = vsyncpa [#allocation4], 1 }
 0x25a   :  { %724 = vsyncpa [#allocation4 + $0x1], 1 }

</bundles_post_ra>
